<compile_context>
chip_gen: v5e
topology: v5e:2x2
jax: 0.10.0
libtpu: 0.0.40
codegen_flags: <defaults>
</compile_context>

<pallas_src>
import functools

import jax
import jax.numpy as jnp
from jax import lax
from jax.experimental import pallas as pl
from jax.experimental.pallas import tpu as pltpu


@functools.lru_cache(maxsize=None)
def _roll_like_numpy() -> bool:
    """One-time probe of the pltpu.roll convention (positive shift moves data
    toward higher indices, like jnp.roll).  Keeps the kernel robust."""

    def probe(x_ref, o_ref):
        o_ref[...] = pltpu.roll(x_ref[...], shift=1, axis=1)

    x = jnp.arange(8 * 128, dtype=jnp.float32).reshape(8, 128)
    got = pl.pallas_call(probe, out_shape=jax.ShapeDtypeStruct((8, 128), jnp.float32))(x)
    return bool(jnp.array_equal(got, jnp.roll(x, 1, axis=1)))


def _plan_tiles(M, Cp, x_itemsize, mm_itemsize, max_lane_tile, weight_bufs):
    """Pick the lane tile TL from the *real* per-step VMEM footprint.

    Returns (TL, num_tiles, padded_M, vmem_limit_bytes)."""
    try:
        cap = int(pltpu.get_tpu_info().vmem_capacity_bytes)   # per-core VMEM
    except Exception:                                         # pragma: no cover
        cap = 64 << 20                                        # v7x floor
    budget = int(cap * 0.45)
    # Per lane-column bytes: 2x double-buffered in + out tiles, the (3Cp,·)
    # stacked RHS / rolled temps (x2 convs), and the f32 y/h/out intermediates.
    per_col = Cp * (4 * x_itemsize + 8 * mm_itemsize + 16)
    fixed = 2 * weight_bufs * 3 * Cp * Cp * mm_itemsize + (1 << 20)
    avail = max(budget - fixed, 128 * per_col)
    tl = min(int(max_lane_tile), int(avail // per_col), -(-M // 128) * 128)
    if M > 128:
        # Keep at least two grid steps: feeds both v7x TensorCores ("parallel"
        # axis) and gives the pipeline something to overlap.
        tl = min(tl, max(128, (((M + 1) // 2) + 127) // 128 * 128))
    tl = max(128, tl // 128 * 128)
    nt = -(-M // tl)
    Mp = nt * tl
    est = per_col * tl + fixed
    vmem_limit = int(min(int(cap * 0.9), max(est + (8 << 20), 32 << 20)))
    return tl, nt, Mp, vmem_limit


def _make_kernel(*, L, TL, Cp, lsh, rsh, mm_dtype):
    f32 = jnp.float32

    def kernel(x_ref, x_hbm, w1_ref, b1_ref, w2_ref, b2_ref, o_ref,
               xl_ref, xr_ref, sem):
        t = pl.program_id(0)
        nt = pl.num_programs(0)
        s = t * TL                                   # first global column of this tile

        # --- 1) Kick off the two tiny (Cp,2) halo DMAs immediately; their latency
        #        is hidden behind the conv1 RHS build + main MXU matmul below.
        @pl.when(t > 0)
        def _():
            pltpu.make_async_copy(x_hbm.at[:, pl.ds(s - 2, 2)], xl_ref, sem.at[0]).start()

        @pl.when(t < nt - 1)
        def _():
            pltpu.make_async_copy(x_hbm.at[:, pl.ds(s + TL, 2)], xr_ref, sem.at[1]).start()

        @pl.when(t == 0)                             # array edge -> zero halo
        def _():
            xl_ref[...] = jnp.zeros_like(xl_ref)

        @pl.when(t == nt - 1)
        def _():
            xr_ref[...] = jnp.zeros_like(xr_ref)

        x_t = x_ref[...]                             # (Cp, TL)
        w1f = w1_ref[...]                            # (Cp, 3Cp) = [W1_tap0 | W1_tap1 | W1_tap2]
        w2f = w2_ref[...]
        b1v = b1_ref[...]                            # (Cp, 1) f32
        b2v = b2_ref[...]

        # --- 2) Column masks, computed once, reused by both convs.  pos is the
        #        position inside a length-L sequence; zeroing cross-sequence
        #        neighbours realises Conv1d(padding='same') zero padding.
        jcol = lax.broadcasted_iota(jnp.int32, (1, TL), 1)
        pos = (s + jcol) % L
        m_left = (pos != 0) & (jcol != 0)            # col j may take col j-1 from this tile
        m_right = (pos != L - 1) & (jcol != TL - 1)  # col j may take col j+1 from this tile

        def stacked_rhs(u):
            """(Cp,TL) -> (3Cp,TL): [u_{j-1}; u_j; u_{j+1}], invalid columns zeroed."""
            um1 = jnp.where(m_left, pltpu.roll(u, shift=lsh, axis=1), 0)
            up1 = jnp.where(m_right, pltpu.roll(u, shift=rsh, axis=1), 0)
            return jnp.concatenate([um1, u, up1], axis=0)

        # --- 3) conv1 main matmul: all three taps fused into ONE MXU op with a
        #        3Cp contraction dim and a (Cp, TL) result.
        x_m = x_t.astype(mm_dtype)
        y1 = jnp.dot(w1f, stacked_rhs(x_m), preferred_element_type=f32)   # (Cp, TL)

        # --- 4) Halo columns are only needed from here on: wait now (the DMAs had
        #        the whole main matmul to complete).
        @pl.when(t > 0)
        def _():
            pltpu.make_async_copy(x_hbm.at[:, pl.ds(s - 2, 2)], xl_ref, sem.at[0]).wait()

        @pl.when(t < nt - 1)
        def _():
            pltpu.make_async_copy(x_hbm.at[:, pl.ds(s + TL, 2)], xr_ref, sem.at[1]).wait()

        xl = xl_ref[...].astype(mm_dtype)            # x[:, s-2 : s]
        xr = xr_ref[...].astype(mm_dtype)            # x[:, s+TL : s+TL+2]

        # Scalar validity of neighbours that live outside the tile (all mod
        # operands kept non-negative).
        v_c0 = (s % L) != 0                          # col s      has a left  neighbour (s-1)
        v_c1 = ((s + TL - 1) % L) != L - 1           # col s+TL-1 has a right neighbour (s+TL)
        v_lm2 = ((s + L - 1) % L) != 0               # col s-1    has a left  neighbour (s-2)
        v_l0 = ((s + L - 1) % L) != L - 1            # col s-1    has a right neighbour (s)
        v_rm1 = ((s + TL) % L) != 0                  # col s+TL   has a left  neighbour (s+TL-1)
        v_rp1 = ((s + TL) % L) != L - 1              # col s+TL   has a right neighbour (s+TL+1)

        z1 = jnp.zeros((Cp, 1), mm_dtype)

        def gate(c, valid):                          # zero a (Cp,1) column unless `valid`
            return jnp.where(valid, c, 0).astype(mm_dtype)

        # --- 5) ONE small edge matmul for everything that touches the halo:
        #        col 0 -> conv1 output at column s-1   (conv2's left  halo)
        #        col 1 -> conv1 output at column s+TL  (conv2's right halo)
        #        col 2 -> tap0 term missing from y1[:, 0]     (W1_0 @ x[s-1])
        #        col 3 -> tap2 term missing from y1[:, TL-1]  (W1_2 @ x[s+TL])
        tap0 = jnp.concatenate([gate(xl[:, 0:1], v_lm2), gate(x_m[:, TL - 1:TL], v_rm1),
                                gate(xl[:, 1:2], v_c0), z1], axis=1)
        tap1 = jnp.concatenate([xl[:, 1:2], xr[:, 0:1], z1, z1], axis=1)
        tap2 = jnp.concatenate([gate(x_m[:, 0:1], v_l0), gate(xr[:, 1:2], v_rp1),
                                z1, gate(xr[:, 0:1], v_c1)], axis=1)
        e1 = jnp.dot(w1f, jnp.concatenate([tap0, tap1, tap2], axis=0),
                     preferred_element_type=f32)     # (Cp, 4)

        h_l = jnp.maximum(e1[:, 0:1] + b1v, 0.0)     # relu(conv1) at column s-1
        h_r = jnp.maximum(e1[:, 1:2] + b1v, 0.0)     # relu(conv1) at column s+TL
        fix1 = jnp.where(jcol == 0, e1[:, 2:3],
                         jnp.where(jcol == TL - 1, e1[:, 3:4], 0.0))
        h_t = jnp.maximum(y1 + fix1 + b1v, 0.0)      # (Cp, TL) f32 hidden activation

        # --- 6) conv2 (same fused structure) + residual + relu.
        # (For bf16 matmul mode h is rounded to bf16 between convs, matching a
        #  bf16 PyTorch forward; the f32 path keeps full f32 precision.)
        h_m = h_t.astype(mm_dtype)
        y2 = jnp.dot(w2f, stacked_rhs(h_m), preferred_element_type=f32)   # (Cp, TL)

        e2_rhs = jnp.concatenate(
            [jnp.concatenate([gate(h_l.astype(mm_dtype), v_c0), z1], axis=1),   # tap0
             jnp.zeros((Cp, 2), mm_dtype),                                      # tap1
             jnp.concatenate([z1, gate(h_r.astype(mm_dtype), v_c1)], axis=1)],  # tap2
            axis=0)                                  # (3Cp, 2)
        e2 = jnp.dot(w2f, e2_rhs, preferred_element_type=f32)                   # (Cp, 2)
        fix2 = jnp.where(jcol == 0, e2[:, 0:1],
                         jnp.where(jcol == TL - 1, e2[:, 1:2], 0.0))

        out = y2 + fix2 + b2v + x_t.astype(f32)
        o_ref[...] = jnp.maximum(out, 0.0).astype(o_ref.dtype)

    return kernel


def residual_block(x, w1, b1, w2, b2, *, max_lane_tile=2048, bf16_matmul=None):
    """x: (N, C, L); w1, w2: (C, C, 3) PyTorch [out, in, k] layout; b1, b2: (C,)."""
    N, C, L = x.shape
    M = N * L

    # bf16 matmul operands (f32 accumulate) pay off only in the compute-bound
    # large-C regime; keep exact f32 for small C (and for the tests below).
    if bf16_matmul is None:
        bf16_matmul = bool(x.dtype == jnp.float32 and C >= 256)
    mm_dtype = jnp.bfloat16 if (bf16_matmul or x.dtype == jnp.bfloat16) else x.dtype
    mm_size = jnp.dtype(mm_dtype).itemsize
    x_size = jnp.dtype(x.dtype).itemsize

    # Pad channels to the sublane quantum so no in-kernel concat/slice of the
    # stacked (3Cp, ·) RHS crosses a sublane tile boundary.
    sub = 16 if mm_size < 4 else 8
    Cp = -(-C // sub) * sub

    # Grid-invariant weights: single-buffer them once they are big enough to
    # matter (their constant index_map already means a single DMA either way).
    w_bytes = 3 * Cp * Cp * mm_size
    w_kwargs = {"pipeline_mode": pl.Buffered(1)} if w_bytes >= (1 << 20) else {}
    weight_bufs = 1 if w_kwargs else 2

    TL, nt, Mp, vmem_limit = _plan_tiles(M, Cp, x_size, mm_size, max_lane_tile, weight_bufs)
    lsh, rsh = (1, TL - 1) if _roll_like_numpy() else (TL - 1, 1)

    # Host-side packing: batch into lanes ((N,C,L) -> (C, N*L)), channels padded
    # to Cp, lane axis padded to a whole number of tiles (padding masked/sliced).
    xf = jnp.transpose(x, (1, 0, 2)).reshape(C, M)
    xp = jnp.pad(xf, ((0, Cp - C), (0, Mp - M)))

    def stack_w(w):  # (C, C, 3) -> (Cp, 3Cp):  [:, k*Cp + i] = w[:, i, k]
        wk = jnp.transpose(w, (2, 0, 1))
        wk = jnp.pad(wk, ((0, 0), (0, Cp - C), (0, Cp - C)))
        return jnp.transpose(wk, (1, 0, 2)).reshape(Cp, 3 * Cp).astype(mm_dtype)

    w1f, w2f = stack_w(w1), stack_w(w2)
    b1c = jnp.pad(b1.astype(jnp.float32), (0, Cp - C)).reshape(Cp, 1)
    b2c = jnp.pad(b2.astype(jnp.float32), (0, Cp - C)).reshape(Cp, 1)

    kernel = _make_kernel(L=L, TL=TL, Cp=Cp, lsh=lsh, rsh=rsh, mm_dtype=mm_dtype)

    out_flat = pl.pallas_call(
        kernel,
        out_shape=jax.ShapeDtypeStruct((Cp, Mp), x.dtype),
        grid_spec=pltpu.PrefetchScalarGridSpec(
            num_scalar_prefetch=0,
            grid=(nt,),
            in_specs=[
                pl.BlockSpec((Cp, TL), lambda t: (0, t)),        # pipelined x lane-tile
                pl.BlockSpec(memory_space=pl.ANY),               # raw HBM x for halo DMAs
                pl.BlockSpec((Cp, 3 * Cp), lambda t: (0, 0), **w_kwargs),
                pl.BlockSpec((Cp, 1), lambda t: (0, 0)),
                pl.BlockSpec((Cp, 3 * Cp), lambda t: (0, 0), **w_kwargs),
                pl.BlockSpec((Cp, 1), lambda t: (0, 0)),
            ],
            out_specs=pl.BlockSpec((Cp, TL), lambda t: (0, t)),
            scratch_shapes=[
                pltpu.VMEM((Cp, 2), x.dtype),                    # left halo  x[:, s-2:s]
                pltpu.VMEM((Cp, 2), x.dtype),                    # right halo x[:, s+TL:s+TL+2]
                pltpu.SemaphoreType.DMA((2,)),
            ],
        ),
        compiler_params=pltpu.CompilerParams(
            dimension_semantics=("parallel",),
            vmem_limit_bytes=vmem_limit,
        ),
    )(xp, xp, w1f, b1c, w2f, b2c)

    return jnp.transpose(out_flat[:C, :M].reshape(C, N, L), (1, 0, 2))


def reference(x, w1, b1, w2, b2):
    """Pure-JAX reference using lax 1-D convolution (independent of the kernel)."""
    dn = ("NCH", "OIH", "NCH")

    def conv(z, w, b):
        y = lax.conv_general_dilated(z, w, window_strides=(1,), padding="SAME",
                                     dimension_numbers=dn)
        return y + b[None, :, None]

    h = jax.nn.relu(conv(x, w1, b1))
    return jax.nn.relu(conv(h, w2, b2) + x)


if __name__ == "__main__":
    def make_inputs(key, n, c, l):
        kx, kw1, kb1, kw2, kb2 = jax.random.split(key, 5)
        bound = 1.0 / jnp.sqrt(jnp.float32(c * 3))   # PyTorch Conv1d default init range
        x = jax.random.normal(kx, (n, c, l), dtype=jnp.float32)
        w1 = jax.random.uniform(kw1, (c, c, 3), jnp.float32, -bound, bound)
        b1 = jax.random.uniform(kb1, (c,), jnp.float32, -bound, bound)
        w2 = jax.random.uniform(kw2, (c, c, 3), jnp.float32, -bound, bound)
        b2 = jax.random.uniform(kb2, (c,), jnp.float32, -bound, bound)
        return x, w1, b1, w2, b2

    k1, k2 = jax.random.split(jax.random.PRNGKey(0))

    # 1) Spec-sized test: batch=2, channels=4, length=16 (single lane tile,
    #    channel padding 4 -> 8 exercised).
    args = make_inputs(k1, 2, 4, 16)
    out = jax.block_until_ready(residual_block(*args))
    ref = jax.block_until_ready(reference(*args))
    assert out.shape == args[0].shape and out.dtype == args[0].dtype
    assert jnp.allclose(out, ref, atol=1e-5, rtol=1e-5), "mismatch (single-tile path)"

    # 2) Multi-tile test: forces TL=128 so tile edges land both inside a sequence
    #    (exercises the overlapped halo DMAs + edge corrections) and on a batch
    #    boundary (exercises the 'same'-padding masks).
    args2 = make_inputs(k2, 2, 8, 256)
    out2 = jax.block_until_ready(residual_block(*args2, max_lane_tile=128))
    ref2 = jax.block_until_ready(reference(*args2))
    assert jnp.allclose(out2, ref2, atol=1e-4, rtol=1e-4), "mismatch (multi-tile path)"

    print("KERNEL_OK")
</pallas_src>

<mosaic_0001>
module attributes {stable_mosaic.version = 11 : i64} {
  func.func @probe(%arg0: memref<8x128xf32, #tpu.memory_space<vmem>>, %arg1: memref<8x128xf32, #tpu.memory_space<vmem>>) attributes {dimension_semantics = [], scalar_prefetch = 0 : i64, scratch_operands = 0 : i64, tpu.core_type = #tpu.core_type<tc>} {
    %c0 = arith.constant 0 : index
    %c0_0 = arith.constant 0 : index
    %0 = vector.load %arg0[%c0, %c0_0] : memref<8x128xf32, #tpu.memory_space<vmem>>, vector<8x128xf32>
    %c1_i32 = arith.constant 1 : i32
    %1 = tpu.dynamic_rotate %0 by %c1_i32 dim 1 : vector<8x128xf32>, i32 -> vector<8x128xf32>
    %c0_1 = arith.constant 0 : index
    %c0_2 = arith.constant 0 : index
    %2 = vector.load %arg1[%c0_1, %c0_2] : memref<8x128xf32, #tpu.memory_space<vmem>>, vector<8x128xf32>
    tpu.vector_store %arg1[%c0_1, %c0_2], %1 {strides = array<i32>} : memref<8x128xf32, #tpu.memory_space<vmem>>, vector<8x128xf32>,
    return
  }
}

</mosaic_0001>

<bundles_post_ra>
// kernel: tpu_custom_call.1
= control target key start
LH: loop header
LB: loop body
LE: loop exit
PB: predicated region body
PF: predicated region fallthrough
CT: control target
= control target key end

     0   :  { %6 = vsyncpa [#allocation3], 0  ;;  %s118_s0 = inlined_call_operand.hbm [shape: f32[8,128], index: 0, kind: input, shape index: {}]   ;;  %s119_s1 = inlined_call_operand.hbm [shape: f32[8,128], index: 1, kind: output, shape index: {}]  }
   0x1   :  { %7 = vsyncpa [#allocation4], 0  ;;  %s13_s8 = sshll.u32 %s118_s0, 4  ;;  %s99_s9 = smov [#allocation2]   ;;  %s14_s8 = int_to_ptr.hbm [resolvable:$true] %s13_s8 }
   0x2   :  { %s15_s10 = sshll.u32 %s99_s9, 4  ;;  %s16_s10 = int_to_ptr.vmem [resolvable:$true] %s15_s10 }
   0x3   :  { %18 = dma.hbm_to_vmem [thread:$0]  %s14_s8, 128, %s16_s10, [#allocation3]  }
   0x4   :  { %95 = dma.done.wait [#allocation3], 128  }
   0x5   :  { %96 = vsyncadd [#allocation3], 4294967168  ;;  %v23_v0 = vld [vmem:[#allocation2] sm:$0xff]  ;;  %s100_s11 = smov 1   ;;  %s101_s12 = smov [#allocation5]  }
   0x6   :  { %24 = vrot.lane.b32.xlu0 %v23_v0, %s100_s11  ;;  %s32_s13 = sshll.u32 %s101_s12, 4  ;;  %s34_s16 = sshll.u32 %s119_s1, 4  ;;  %s33_s13 = int_to_ptr.vmem [resolvable:$true] %s32_s13  ;;  %s35_s16 = int_to_ptr.hbm [resolvable:$true] %s34_s16 }
  0x78   :  { %v25_v1 = vpop.permute.xlu0 %24 }
  0x79   :  { %26 = vst [vmem:[#allocation5] sm:$0xff] %v25_v1 }
  0x7a   :  { %37 = dma.vmem_to_hbm [thread:$0]  %s33_s13, 128, %s35_s16, [#allocation4]  }
  0x7b   :  { %97 = dma.done.wait [#allocation4], 128  }
  0x7c   :  { %98 = vsyncadd [#allocation4], 4294967168 }
  0x7d   :  { %42 = vsyncpa [#allocation3], 1 }
  0x7e   :  { %43 = vsyncpa [#allocation4], 1 }

</bundles_post_ra>
